<compile_context>
chip_gen: v7x
topology: tpu7x:2x2x1
jax: 0.10.0
libtpu: 0.0.40
codegen_flags: <defaults>
</compile_context>

<pallas_src>
import jax
import jax.numpy as jnp
from jax.experimental import pallas as pl
from jax.experimental.pallas import tpu as pltpu


# ---------------------------------------------------------------------------
# True identity: the forward pass of nn.Identity.
# ---------------------------------------------------------------------------
def identity(x: jax.Array) -> jax.Array:
    """nn.Identity forward: y = x.  No copy, no kernel — the fastest identity."""
    return x


# ---------------------------------------------------------------------------
# Path 1 (default): direct HBM -> HBM DMA copy, no VMEM round-trip.
# ---------------------------------------------------------------------------
def _dma_copy_kernel(x_hbm_ref, o_hbm_ref, sem):
    # A single large async copy straight from the input HBM buffer to the
    # output HBM buffer.  The DMA engine streams reads and writes concurrently,
    # so one descriptor already runs at the HBM read+write roofline.
    cp = pltpu.make_async_copy(x_hbm_ref, o_hbm_ref, sem)
    cp.start()
    cp.wait()


def _identity_copy_dma(x: jax.Array) -> jax.Array:
    return pl.pallas_call(
        _dma_copy_kernel,
        out_shape=jax.ShapeDtypeStruct(x.shape, x.dtype),
        in_specs=[pl.BlockSpec(memory_space=pl.ANY)],
        out_specs=pl.BlockSpec(memory_space=pl.ANY),
        scratch_shapes=[pltpu.SemaphoreType.DMA],
    )(x)


# ---------------------------------------------------------------------------
# Path 2: tiled, lane-dense VMEM-staged copy (kept as an alternative).
# ---------------------------------------------------------------------------
def _copy_kernel(x_ref, o_ref):
    # Whole-tile copy: VMEM block in -> VMEM block out.
    o_ref[...] = x_ref[...]


_PER_BUFFER_BYTES = 6 * 1024 * 1024    # ~6 MiB/tile -> 4 double buffers ~24 MiB
_VMEM_LIMIT_BYTES = 32 * 1024 * 1024   # explicit scoped-VMEM request (safe on
                                       # v5e/v6e (128 MiB phys) and v7x (64 MiB))


def _lane_dense_2d(n: int):
    """Pick a (rows, cols) factorization with cols a large multiple of 128.

    Returns None when n has no 128-divisible factorization; the caller then
    routes to the DMA path (the old (1, n) single-block fallback is gone).
    """
    for cols in (8192, 4096, 2048, 1024, 512, 384, 256, 128):
        if n % cols == 0:
            return n // cols, cols
    return None


def _identity_copy_vmem(x: jax.Array) -> jax.Array:
    n = x.size
    dtype = x.dtype
    itemsize = jnp.dtype(dtype).itemsize

    tiling = _lane_dense_2d(n)
    if tiling is None:
        # No lane-dense 2-D factorization: the DMA path has no layout rules.
        return _identity_copy_dma(x)
    rows, cols = tiling
    x2d = x.reshape(rows, cols)

    # Dtype-aware sublane multiple: 8 for f32, 16 for bf16, 32 for int8/fp8
    # (sub-32-bit dtypes pack along sublanes).
    sub = max(8, 32 // itemsize)
    row_bytes = cols * itemsize
    total_bytes = n * itemsize

    # Largest tile whose 2-input + 2-output double buffers fit the explicit
    # scoped-VMEM budget requested below, with headroom.
    max_tr = max(sub, (_PER_BUFFER_BYTES // row_bytes) // sub * sub)

    # For multi-MiB arrays force >= ~4 grid steps so the pipeline overlaps
    # writeback of block i-1 with prefetch of block i+1 and the "parallel"
    # axis gives both TensorCores work on v7x (grid=(1,) would idle one TC).
    if total_bytes >= 4 * 1024 * 1024:
        cap = max(sub, (rows // 4) // sub * sub)
        max_tr = min(max_tr, cap)

    tr = min(max_tr, rows)     # tr == rows -> block equals full dims (legal);
    grid = (pl.cdiv(rows, tr)) # tr < rows  -> tr % sub == 0, cols % 128 == 0.
    grid = (grid,)

    out2d = pl.pallas_call(
        _copy_kernel,
        out_shape=jax.ShapeDtypeStruct((rows, cols), dtype),
        grid_spec=pl.GridSpec(
            grid=grid,
            in_specs=[pl.BlockSpec((tr, cols), lambda i: (i, 0))],
            out_specs=pl.BlockSpec((tr, cols), lambda i: (i, 0)),
        ),
        compiler_params=pltpu.CompilerParams(
            # Row tiles are independent: shard across both TensorCores on v7x.
            dimension_semantics=("parallel",),
            vmem_limit_bytes=_VMEM_LIMIT_BYTES,
        ),
    )(x2d)
    return out2d.reshape(x.shape)


# ---------------------------------------------------------------------------
# Public copy entry point.
# ---------------------------------------------------------------------------
def identity_copy(x: jax.Array, *, method: str = "dma",
                  alias_input: bool = False) -> jax.Array:
    """Materialize a copy of `x` (identity with a fresh buffer).

    method="dma"  : direct HBM->HBM async copy (default, fastest everywhere).
    method="vmem" : tiled lane-dense VMEM-staged copy.
    alias_input   : an "in-place identity" re-writes the same bytes for no
                    benefit (and forces a defensive copy if x is not donated),
                    so we simply return x.
    """
    if x.size == 0:
        return x
    if alias_input:
        return x
    if method == "vmem":
        return _identity_copy_vmem(x)
    return _identity_copy_dma(x)


if __name__ == "__main__":
    key = jax.random.PRNGKey(0)
    # Small NCHW input consistent with a classifier feature map.
    x = jax.random.normal(key, (2, 4, 16, 16), dtype=jnp.float32)

    # True identity path (no kernel): returns x itself.
    y_fast = identity(x)
    assert y_fast is x

    # Default path: direct HBM->HBM DMA copy.
    y_dma = identity_copy(x)
    jax.block_until_ready(y_dma)
    assert y_dma.shape == x.shape, (y_dma.shape, x.shape)
    assert y_dma.dtype == x.dtype, (y_dma.dtype, x.dtype)
    assert bool(jnp.all(y_dma == x)), "DMA identity copy mismatch"

    # Alternative path: tiled, lane-dense VMEM-staged copy.
    y_vmem = identity_copy(x, method="vmem")
    jax.block_until_ready(y_vmem)
    assert bool(jnp.all(y_vmem == x)), "VMEM identity copy mismatch"

    # Size not divisible by 128: the vmem request routes to the DMA path
    # (no more (1, n) single-block fallback).
    x_odd = jax.random.normal(key, (3, 5, 7), dtype=jnp.float32)
    y_odd = identity_copy(x_odd, method="vmem")
    jax.block_until_ready(y_odd)
    assert y_odd.shape == x_odd.shape
    assert bool(jnp.all(y_odd == x_odd)), "odd-size identity copy mismatch"

    print("KERNEL_OK")
</pallas_src>

<mosaic_0001>
module attributes {stable_mosaic.version = 11 : i64} {
  func.func @_dma_copy_kernel(%arg0: memref<2x4x16x16xf32, #tpu.memory_space<any>>, %arg1: memref<2x4x16x16xf32, #tpu.memory_space<any>>, %arg2: memref<!tpu.dma_semaphore, #tpu.memory_space<semaphore_mem>>) attributes {dimension_semantics = [], scalar_prefetch = 0 : i64, scratch_operands = 1 : i64, tpu.core_type = #tpu.core_type<tc>} {
    tpu.enqueue_dma source(%arg0 : memref<2x4x16x16xf32, #tpu.memory_space<any>>) target(%arg1 : memref<2x4x16x16xf32, #tpu.memory_space<any>>) target_semaphore(%arg2 : memref<!tpu.dma_semaphore, #tpu.memory_space<semaphore_mem>>)
    tpu.wait_dma2 semaphore(%arg2 : memref<!tpu.dma_semaphore, #tpu.memory_space<semaphore_mem>>) src(%arg0 : memref<2x4x16x16xf32, #tpu.memory_space<any>>) dst(%arg1 : memref<2x4x16x16xf32, #tpu.memory_space<any>>)
    return
  }
}

</mosaic_0001>

<bundles_post_ra>
// kernel: tpu_custom_call.1
= control target key start
LH: loop header
LB: loop body
LE: loop exit
PB: predicated region body
PF: predicated region fallthrough
CT: control target
= control target key end

     0   :  { %s36_s6 = smov [#allocation2]   ;;  %s37_s7 = smov [#allocation3]   ;;  %s55_s0 = inlined_call_operand.hbm [shape: f32[2,4,16,16], index: 0, kind: input, shape index: {}]   ;;  %s56_s1 = inlined_call_operand.hbm [shape: f32[2,4,16,16], index: 1, kind: output, shape index: {}]  }
   0x1   :  { %s38_s8 = smov 0  }
   0x2   :  { %18 = dma.general %s55_s0, 2048, %s56_s1, %s36_s6, %s37_s7, [#allocation4], %s38_s8, 0  }
   0x3   :  { %34 = dma.done.wait [#allocation2], 2048 }
   0x4   :  { %35 = vsyncadd [#allocation2], 4294965248 }
   0x5   :  { %24 = vsyncmov [#allocation2] }
   0x8   :  { %s25_s13 = vpop.sfrf %24 }
   0x9   :  { %p30_p0 = scmp.ne.s32.totalorder %s25_s13, 0 }
   0xb   :  { %29 = shalt.err (%p30_p0)  }

</bundles_post_ra>
